<compile_context>
chip_gen: v7x
topology: tpu7x:2x2x1
jax: 0.10.0
libtpu: 0.0.40
codegen_flags: <defaults>
</compile_context>

<pallas_src>
import jax
import jax.numpy as jnp
from jax.experimental import pallas as pl
from jax.experimental.pallas import tpu as pltpu


def _round_up(x, m):
    return ((x + m - 1) // m) * m


def attention_fc_kernel(x_ref, wfused_ref, bfused_ref, w2_ref, b2_ref,
                        wd_ref, bd_ref, out_ref):
    x = x_ref[...].astype(jnp.float32)                     # [TB, F] f32
    x_mm = x.astype(wfused_ref.dtype)                      # bf16 for MXU

    # Fused first pass: lane 0 = fc_normal, lanes 1..hidden = attention layer 1.
    fused = jnp.dot(x_mm, wfused_ref[...],
                    preferred_element_type=jnp.float32) + bfused_ref[...]   # [TB, HP] f32

    p_normal = fused[:, 0:1]                                # pre-ReLU, [TB, 1]
    h = jnp.maximum(fused, 0.0)                             # ReLU on full slab; w2 rows for
                                                            # lane 0 / padding lanes are zero.

    a = jnp.dot(h.astype(w2_ref.dtype), w2_ref[...],
                preferred_element_type=jnp.float32) + b2_ref[...]           # [TB, F] f32
    att = jax.nn.sigmoid(a)

    # Elementwise in f32 (v5e-safe), matmul operands in bf16 (f32 accumulate).
    weighted = (x * att).astype(wd_ref.dtype)
    p_dis = jnp.dot(weighted, wd_ref[...],
                    preferred_element_type=jnp.float32) + bd_ref[...]       # [TB, C], col 0 == 0

    out_ref[...] = p_dis.astype(out_ref.dtype)
    out_ref[:, 0:1] = p_normal.astype(out_ref.dtype)        # single 1-lane store


def prepare_params(params, matmul_dtype=jnp.bfloat16):
    """One-time weight fusion / padding / cast (do NOT redo per forward call)."""
    F, hidden = params["w1"].shape
    C = params["bd"].shape[-1] + 1
    HP = _round_up(hidden + 1, 128)

    # Fused first-layer weight: lane 0 <- fc_normal, lanes 1..hidden <- attention[0].
    wfused = jnp.zeros((F, HP), jnp.float32)
    wfused = wfused.at[:, 0].set(params["wn"][:, 0])
    wfused = wfused.at[:, 1:hidden + 1].set(params["w1"])
    bfused = jnp.zeros((1, HP), jnp.float32)
    bfused = bfused.at[:, 0].set(params["bn"][:, 0])
    bfused = bfused.at[:, 1:hidden + 1].set(params["b1"])

    # Second attention layer zero-padded to HP rows: row 0 (fc_normal lane) and
    # rows > hidden stay EXACTLY zero -> ReLU(p_normal)/padding never leak.
    w2p = jnp.zeros((HP, F), jnp.float32).at[1:hidden + 1, :].set(params["w2"])

    # Disease head with column 0 reserved (zero) for p_normal.
    wdp = jnp.zeros((F, C), jnp.float32).at[:, 1:].set(params["wd"])
    bdp = jnp.zeros((1, C), jnp.float32).at[:, 1:].set(params["bd"])

    return dict(
        wfused=wfused.astype(matmul_dtype),
        bfused=bfused,
        w2=w2p.astype(matmul_dtype),
        b2=params["b2"].astype(jnp.float32),
        wd=wdp.astype(matmul_dtype),
        bd=bdp,
        F=F, hidden=hidden, HP=HP, C=C,
    )


def attention_fc(x, prep, *, block_b=2048):
    """x: [B, in_features] f32; prep: output of prepare_params."""
    B, F = x.shape
    assert F == prep["F"], (F, prep["F"])
    HP, C = prep["HP"], prep["C"]

    # Batch tile: 16-sublane aligned (bf16 packing), >= 2 grid steps for
    # moderate B (v7x megacore), capped at block_b.  No wrapper-side padding:
    # Pallas handles the partial last block.
    TB = min(block_b, max(16, _round_up(-(-B // 2), 16)))
    grid = (pl.cdiv(B, TB),)

    const = lambda shape: pl.BlockSpec(shape, lambda i: (0, 0))

    w_item = jnp.dtype(prep["wfused"].dtype).itemsize
    x_item = jnp.dtype(x.dtype).itemsize
    weight_bytes = (F * HP + HP * F + F * C) * w_item + (HP + F + C) * 4
    tile_bytes = TB * F * x_item + TB * C * x_item
    # Weights are single-buffered (constant index_maps); x/out tiles are
    # double-buffered by the pipeline.
    needed = weight_bytes + 2 * tile_bytes + (4 << 20)
    try:
        vmem_cap = int(pltpu.get_tpu_info().vmem_capacity_bytes)
    except Exception:
        vmem_cap = 64 * 1024 * 1024
    vmem_limit = int(min(max(needed, 32 * 1024 * 1024), int(0.9 * vmem_cap)))
    # TODO(synk): for very large in_features (w2 ~ F^2 bytes > ~half VMEM, e.g.
    # F ~ 8k on v7x) tile the second matmul over its F output dim with an extra
    # "arbitrary" grid axis instead of keeping all weights VMEM-resident.

    cost = pl.CostEstimate(
        flops=2 * B * (F * HP + HP * F + F * C),
        transcendentals=B * F,                               # sigmoid
        bytes_accessed=weight_bytes + B * F * x_item + B * C * x_item,
    )

    return pl.pallas_call(
        attention_fc_kernel,
        out_shape=jax.ShapeDtypeStruct((B, C), x.dtype),
        grid=grid,
        in_specs=[
            pl.BlockSpec((TB, F), lambda i: (i, 0)),         # x (batch-tiled, f32)
            const((F, HP)),                                  # fused [wn | w1 | 0]
            const((1, HP)),                                  # fused [bn | b1 | 0]
            const((HP, F)),                                  # w2 zero-padded to HP rows
            const((1, F)),                                   # b2
            const((F, C)),                                   # wd (col 0 zero)
            const((1, C)),                                   # bd (col 0 zero)
        ],
        out_specs=pl.BlockSpec((TB, C), lambda i: (i, 0)),   # unpadded [B, C] output
        compiler_params=pltpu.CompilerParams(
            dimension_semantics=("parallel",),
            vmem_limit_bytes=vmem_limit,
        ),
        cost_estimate=cost,
    )(x, prep["wfused"], prep["bfused"], prep["w2"], prep["b2"],
      prep["wd"], prep["bd"])


def init_params(key, in_features, num_classes):
    """PyTorch-style uniform(-1/sqrt(fan_in), 1/sqrt(fan_in)) init.
    Weights are stored transposed ([in, out]) for the kernel."""
    hidden = in_features // 2

    def linear(key, fan_in, fan_out):
        kw, kb = jax.random.split(key)
        bound = 1.0 / jnp.sqrt(jnp.float32(fan_in))
        w = jax.random.uniform(kw, (fan_in, fan_out), jnp.float32, -bound, bound)
        b = jax.random.uniform(kb, (1, fan_out), jnp.float32, -bound, bound)
        return w, b

    k = jax.random.split(key, 4)
    wn, bn = linear(k[0], in_features, 1)                 # fc_normal
    w1, b1 = linear(k[1], in_features, hidden)            # attention[0]
    w2, b2 = linear(k[2], hidden, in_features)            # attention[2]
    wd, bd = linear(k[3], in_features, num_classes - 1)   # fc_disease
    return dict(wn=wn, bn=bn, w1=w1, b1=b1, w2=w2, b2=b2, wd=wd, bd=bd)


def attention_fc_ref(x, p):
    """Pure-JAX f32 reference of the PyTorch forward."""
    p_normal = x @ p["wn"] + p["bn"]
    h = jnp.maximum(x @ p["w1"] + p["b1"], 0.0)
    att = jax.nn.sigmoid(h @ p["w2"] + p["b2"])
    p_disease = (x * att) @ p["wd"] + p["bd"]
    return jnp.concatenate([p_normal, p_disease], axis=1)


if __name__ == "__main__":
    key = jax.random.PRNGKey(0)

    # (B, in_features, num_classes): second case exercises a partial batch block.
    for (B, in_features, num_classes) in [(8, 32, 5), (6, 32, 3)]:
        key, kx, kp = jax.random.split(key, 3)
        x = jax.random.normal(kx, (B, in_features), jnp.float32)
        params = init_params(kp, in_features, num_classes)
        prep = prepare_params(params)

        out = attention_fc(x, prep)
        out = jax.block_until_ready(out)

        ref = attention_fc_ref(x, params)
        assert out.shape == (B, num_classes), out.shape
        # bf16 matmul operands with f32 accumulation -> loosened tolerance.
        assert jnp.allclose(out, ref, atol=5e-2, rtol=5e-2), (
            f"max abs err {jnp.max(jnp.abs(out - ref))}")

    print("KERNEL_OK")
</pallas_src>

<mosaic_0001>
module attributes {stable_mosaic.version = 11 : i64} {
  func.func @attention_fc_kernel(%arg0: i32, %arg1: memref<16x32xf32, #tpu.memory_space<vmem>>, %arg2: memref<32x128xbf16, #tpu.memory_space<vmem>>, %arg3: memref<1x128xf32, #tpu.memory_space<vmem>>, %arg4: memref<128x32xbf16, #tpu.memory_space<vmem>>, %arg5: memref<1x32xf32, #tpu.memory_space<vmem>>, %arg6: memref<32x5xbf16, #tpu.memory_space<vmem>>, %arg7: memref<1x5xf32, #tpu.memory_space<vmem>>, %arg8: memref<16x5xf32, #tpu.memory_space<vmem>>) attributes {dimension_semantics = [#tpu.dimension_semantics<parallel>], iteration_bounds = array<i64: 1>, scalar_prefetch = 0 : i64, scratch_operands = 0 : i64, tpu.core_type = #tpu.core_type<tc>, window_params = [{transform_indices = @transform_0, window_bounds = array<i64: 16, 32>}, {pipeline_mode = #tpu.pipeline_mode<synchronous>, transform_indices = @transform_1, window_bounds = array<i64: 32, 128>}, {pipeline_mode = #tpu.pipeline_mode<synchronous>, transform_indices = @transform_2, window_bounds = array<i64: 1, 128>}, {pipeline_mode = #tpu.pipeline_mode<synchronous>, transform_indices = @transform_3, window_bounds = array<i64: 128, 32>}, {pipeline_mode = #tpu.pipeline_mode<synchronous>, transform_indices = @transform_4, window_bounds = array<i64: 1, 32>}, {pipeline_mode = #tpu.pipeline_mode<synchronous>, transform_indices = @transform_5, window_bounds = array<i64: 32, 5>}, {pipeline_mode = #tpu.pipeline_mode<synchronous>, transform_indices = @transform_6, window_bounds = array<i64: 1, 5>}, {transform_indices = @transform_7, window_bounds = array<i64: 16, 5>}]} {
    %c0 = arith.constant 0 : index
    %c0_0 = arith.constant 0 : index
    %0 = vector.load %arg1[%c0, %c0_0] : memref<16x32xf32, #tpu.memory_space<vmem>>, vector<16x32xf32>
    %1 = arith.truncf %0 : vector<16x32xf32> to vector<16x32xbf16>
    %c0_1 = arith.constant 0 : index
    %c0_2 = arith.constant 0 : index
    %2 = vector.load %arg2[%c0_1, %c0_2] : memref<32x128xbf16, #tpu.memory_space<vmem>>, vector<32x128xbf16>
    %cst = arith.constant dense<0.000000e+00> : vector<16x128xf32>
    %3 = tpu.matmul %1, %2, %cst {dimension_numbers = #tpu.dot_dimension_numbers<[1], [0], [0], [1], [0, 0, 1, 1], [], []>} : vector<16x32xbf16>, vector<32x128xbf16>, vector<16x128xf32> -> vector<16x128xf32>
    %c0_3 = arith.constant 0 : index
    %c0_4 = arith.constant 0 : index
    %4 = vector.load %arg3[%c0_3, %c0_4] : memref<1x128xf32, #tpu.memory_space<vmem>>, vector<1x128xf32>
    %5 = vector.broadcast %4 : vector<1x128xf32> to vector<16x128xf32>
    %6 = arith.addf %3, %5 : vector<16x128xf32>
    %7 = vector.extract_strided_slice %6 {offsets = [0, 0], sizes = [16, 1], strides = [1, 1]} : vector<16x128xf32> to vector<16x1xf32>
    %cst_5 = arith.constant 0.000000e+00 : f32
    %8 = vector.broadcast %cst_5 : f32 to vector<16x128xf32>
    %9 = arith.maximumf %6, %8 : vector<16x128xf32>
    %10 = arith.truncf %9 : vector<16x128xf32> to vector<16x128xbf16>
    %c0_6 = arith.constant 0 : index
    %c0_7 = arith.constant 0 : index
    %11 = vector.load %arg4[%c0_6, %c0_7] : memref<128x32xbf16, #tpu.memory_space<vmem>>, vector<128x32xbf16>
    %cst_8 = arith.constant dense<0.000000e+00> : vector<16x32xf32>
    %12 = tpu.matmul %10, %11, %cst_8 {dimension_numbers = #tpu.dot_dimension_numbers<[1], [0], [0], [1], [0, 0, 1, 1], [], []>} : vector<16x128xbf16>, vector<128x32xbf16>, vector<16x32xf32> -> vector<16x32xf32>
    %c0_9 = arith.constant 0 : index
    %c0_10 = arith.constant 0 : index
    %13 = vector.load %arg5[%c0_9, %c0_10] : memref<1x32xf32, #tpu.memory_space<vmem>>, vector<1x32xf32>
    %14 = vector.broadcast %13 : vector<1x32xf32> to vector<16x32xf32>
    %15 = arith.addf %12, %14 : vector<16x32xf32>
    %16 = arith.negf %15 : vector<16x32xf32>
    %17 = math.exp %16 : vector<16x32xf32>
    %cst_11 = arith.constant 1.000000e+00 : f32
    %18 = vector.broadcast %cst_11 : f32 to vector<16x32xf32>
    %19 = arith.addf %18, %17 : vector<16x32xf32>
    %20 = arith.divf %18, %19 : vector<16x32xf32>
    %21 = arith.mulf %0, %20 : vector<16x32xf32>
    %22 = arith.truncf %21 : vector<16x32xf32> to vector<16x32xbf16>
    %c0_12 = arith.constant 0 : index
    %c0_13 = arith.constant 0 : index
    %23 = vector.load %arg6[%c0_12, %c0_13] : memref<32x5xbf16, #tpu.memory_space<vmem>>, vector<32x5xbf16>
    %cst_14 = arith.constant dense<0.000000e+00> : vector<16x5xf32>
    %24 = tpu.matmul %22, %23, %cst_14 {dimension_numbers = #tpu.dot_dimension_numbers<[1], [0], [0], [1], [0, 0, 1, 1], [], []>} : vector<16x32xbf16>, vector<32x5xbf16>, vector<16x5xf32> -> vector<16x5xf32>
    %c0_15 = arith.constant 0 : index
    %c0_16 = arith.constant 0 : index
    %25 = vector.load %arg7[%c0_15, %c0_16] : memref<1x5xf32, #tpu.memory_space<vmem>>, vector<1x5xf32>
    %26 = vector.broadcast %25 : vector<1x5xf32> to vector<16x5xf32>
    %27 = arith.addf %24, %26 : vector<16x5xf32>
    %c0_17 = arith.constant 0 : index
    %c0_18 = arith.constant 0 : index
    %28 = vector.load %arg8[%c0_17, %c0_18] : memref<16x5xf32, #tpu.memory_space<vmem>>, vector<16x5xf32>
    tpu.vector_store %arg8[%c0_17, %c0_18], %27 {strides = array<i32>} : memref<16x5xf32, #tpu.memory_space<vmem>>, vector<16x5xf32>,
    %c0_19 = arith.constant 0 : index
    %c0_20 = arith.constant 0 : index
    %29 = vector.load %arg8[%c0_19, %c0_20] : memref<16x5xf32, #tpu.memory_space<vmem>>, vector<16x1xf32>
    tpu.vector_store %arg8[%c0_19, %c0_20], %7 {strides = array<i32>} : memref<16x5xf32, #tpu.memory_space<vmem>>, vector<16x1xf32>,
    return
  }
  func.func @transform_0(%arg0: i32) -> (i32, i32) {
    %c0_i32 = arith.constant 0 : i32
    %c0_i32_0 = arith.constant 0 : i32
    return %arg0, %c0_i32 : i32, i32
  }
  func.func @transform_1(%arg0: i32) -> (i32, i32) {
    %c0_i32 = arith.constant 0 : i32
    %c0_i32_0 = arith.constant 0 : i32
    %c0_i32_1 = arith.constant 0 : i32
    return %c0_i32, %c0_i32_0 : i32, i32
  }
  func.func @transform_2(%arg0: i32) -> (i32, i32) {
    %c0_i32 = arith.constant 0 : i32
    %c0_i32_0 = arith.constant 0 : i32
    %c0_i32_1 = arith.constant 0 : i32
    return %c0_i32, %c0_i32_0 : i32, i32
  }
  func.func @transform_3(%arg0: i32) -> (i32, i32) {
    %c0_i32 = arith.constant 0 : i32
    %c0_i32_0 = arith.constant 0 : i32
    %c0_i32_1 = arith.constant 0 : i32
    return %c0_i32, %c0_i32_0 : i32, i32
  }
  func.func @transform_4(%arg0: i32) -> (i32, i32) {
    %c0_i32 = arith.constant 0 : i32
    %c0_i32_0 = arith.constant 0 : i32
    %c0_i32_1 = arith.constant 0 : i32
    return %c0_i32, %c0_i32_0 : i32, i32
  }
  func.func @transform_5(%arg0: i32) -> (i32, i32) {
    %c0_i32 = arith.constant 0 : i32
    %c0_i32_0 = arith.constant 0 : i32
    %c0_i32_1 = arith.constant 0 : i32
    return %c0_i32, %c0_i32_0 : i32, i32
  }
  func.func @transform_6(%arg0: i32) -> (i32, i32) {
    %c0_i32 = arith.constant 0 : i32
    %c0_i32_0 = arith.constant 0 : i32
    %c0_i32_1 = arith.constant 0 : i32
    return %c0_i32, %c0_i32_0 : i32, i32
  }
  func.func @transform_7(%arg0: i32) -> (i32, i32) {
    %c0_i32 = arith.constant 0 : i32
    %c0_i32_0 = arith.constant 0 : i32
    return %arg0, %c0_i32 : i32, i32
  }
}

</mosaic_0001>

<bundles_post_ra>
// kernel: tpu_custom_call.1
= control target key start
LH: loop header
LB: loop body
LE: loop exit
PB: predicated region body
PF: predicated region fallthrough
CT: control target
= control target key end

     0   :  { %12 = vsyncpa [#allocation3], 0  ;;  %v437_v1 = vmov 0.0   ;;  %vm438_vm0 = vmmov 0   ;;  %vm54_vm1 = vcmask 261120   ;;  %vm296_vm2 = vcmask 39936   ;;  %s555_s0 = inlined_call_operand.vmem [shape: f32[8,32], index: 0, kind: input, shape index: {}]   ;;  %s556_s1 = inlined_call_operand.vmem [shape: bf16[32,128], index: 1, kind: input, shape index: {}]   ;;  %s557_s2 = inlined_call_operand.vmem [shape: f32[1,128], index: 2, kind: input, shape index: {}]   ;;  %s558_s3 = inlined_call_operand.vmem [shape: bf16[128,32], index: 3, kind: input, shape index: {}]   ;;  %s559_s4 = inlined_call_operand.vmem [shape: f32[1,32], index: 4, kind: input, shape index: {}]   ;;  %s560_s5 = inlined_call_operand.vmem [shape: bf16[32,5], index: 5, kind: input, shape index: {}]   ;;  %s561_s6 = inlined_call_operand.vmem [shape: f32[1,5], index: 6, kind: input, shape index: {}]   ;;  %s562_s7 = inlined_call_operand.hbm [shape: f32[8,5], index: 7, kind: output, shape index: {}]  }
   0x1   :  { %v393_v0 = vld [vmem:[%s556_s1] sm:$0xff]   ;;  %352 = vmatprep.subr.bf16.mxu0 %v437_v1  ;;  %360 = vmatprep.subr.bf16.mxu1 %v437_v1  ;;  %v394_v2 = vld [vmem:[%s556_s1 + $0x8] sm:$0xff]   ;;  %v397_v8 = vld [vmem:[%s558_s3 + $0x10] sm:$0xff]   ;;  %vm299_vm3 = vcmask 7168  }
   0x2   :  { %353 = vmatpush3.bf16.msra.mxu0 %v393_v0  ;;  %v491_v3 = vld [vmem:[%s555_s0] sm:$0xff]  ;;  %v496_v4 = vld [vmem:[%s555_s0 + $0x8] sm:$0xff]  ;;  %356 = vmatprep.mubr.msk.bf16.mxu0 %vm438_vm0, %v437_v1  ;;  %v398_v9 = vld [vmem:[%s558_s3 + $0x18] sm:$0xff]  }
   0x3   :  { %354 = vmatprep.subr.bf16.mxu0 %v437_v1  ;;  %v395_v5 = vld [vmem:[%s558_s3] sm:$0xff]   ;;  %376 = vmatprep.mubr.msk.bf16.mxu1 %vm438_vm0, %v437_v1  ;;  %v30_v6 = vpack.c.bf16 %v496_v4, %v491_v3  ;;  %v396_v7 = vld [vmem:[%s558_s3 + $0x8] sm:$0xff]   ;;  %v401_v12 = vld [vmem:[%s558_s3 + $0x30] sm:$0xff]  }
   0x4   :  { %361 = vmatpush3.bf16.msra.mxu1 %v395_v5  ;;  %v399_v10 = vld [vmem:[%s558_s3 + $0x20] sm:$0xff]   ;;  %v400_v11 = vld [vmem:[%s558_s3 + $0x28] sm:$0xff]   ;;  %v402_v13 = vld [vmem:[%s558_s3 + $0x38] sm:$0xff]  }
   0x5   :  { %362 = vmatprep.subr.bf16.mxu1 %v437_v1  ;;  %v318_v14 = vld [vmem:[%s557_s2] ss:$0 sm:$0xff]  ;;  %v404_v25 = vld [vmem:[%s560_s5 + $0x8] sm:$0xff]  }
   0x6   :  { %355 = vmatpush3.bf16.msra.mxu0 %v394_v2  ;;  %v403_v24 = vld [vmem:[%s560_s5] sm:$0xff]  }
   0x7   :  { %380 = vmatprep.subr.bf16.mxu0 %v437_v1  ;;  %v322_v26 = vld [vmem:[%s559_s4] ss:$0 sm:$0xff] }
   0x8   :  { %363 = vmatpush3.bf16.msra.mxu1 %v396_v7  ;;  %v333_v44 = vld [vmem:[%s561_s6] ss:$0 sm:$0xff] }
   0x9   :  { %357 = vmatmul.mubr.msk.bf16.vlgmr.msra.gmra.mrb[0].mxu0 %vm54_vm1, %v30_v6  ;;  %364 = vmatprep.subr.bf16.mxu1 %v437_v1 }
   0xa   :  { %384 = vmatprep.mubr.msk.bf16.mxu0 %vm438_vm0, %v437_v1  ;;  %381 = vmatpush3.bf16.msra.mxu0 %v403_v24 }
   0xb   :  { %382 = vmatprep.subr.bf16.mxu0 %v437_v1 }
   0xc   :  { %365 = vmatpush3.bf16.msra.mxu1 %v397_v8 }
   0xd   :  { %366 = vmatprep.subr.bf16.mxu1 %v437_v1 }
   0xe   :  { %383 = vmatpush3.bf16.msra.mxu0 %v404_v25 }
  0x10   :  { %367 = vmatpush3.bf16.msra.mxu1 %v398_v9 }
  0x11   :  { %368 = vmatprep.subr.bf16.mxu1 %v437_v1 }
  0x14   :  { %369 = vmatpush3.bf16.msra.mxu1 %v399_v10 }
  0x15   :  { %370 = vmatprep.subr.bf16.mxu1 %v437_v1 }
  0x18   :  { %371 = vmatpush3.bf16.msra.mxu1 %v400_v11 }
  0x19   :  { %372 = vmatprep.subr.bf16.mxu1 %v437_v1 }
  0x1c   :  { %373 = vmatpush3.bf16.msra.mxu1 %v401_v12 }
  0x1d   :  { %374 = vmatprep.subr.bf16.mxu1 %v437_v1 }
  0x20   :  { %375 = vmatpush3.bf16.msra.mxu1 %v402_v13 }
  0xdc   :  { %v92_v15 = vpop.f32.mrb[0].mxu0 }
  0xdd   :  { %v93_v16 = vadd.f32 %v318_v14, %v92_v15  ;;  %v358_v17 = vpop.f32.mrb[1].mxu0 }
  0xde   :  { %v95_v18 = vpop.f32.mrb[2].mxu0 }
  0xdf   :  { %v96_v19 = vadd.f32 %v318_v14, %v95_v18  ;;  %v359_v20 = vpop.f32.mrb[3].mxu0  ;;  %v99_v21 = vmax.f32 %v93_v16, 0.0 }
  0xe1   :  { %v100_v22 = vmax.f32 %v96_v19, 0.0 }
  0xe3   :  { %v101_v23 = vpack.c.bf16 %v100_v22, %v99_v21 }
  0xe5   :  { %377 = vmatmul.mubr.bf16.vlgmr.msra.gmra.mrb[0].mxu1 %v101_v23 }
 0x1b8   :  { %v207_v27 = vpop.f32.mrb[0].mxu1 }
 0x1b9   :  { %v208_v28 = vadd.f32 %v322_v26, %v207_v27  ;;  %v378_v29 = vpop.f32.mrb[1].mxu1 }
 0x1ba   :  { %v210_v30 = vpop.f32.mrb[2].mxu1 }
 0x1bb   :  { %v331_v31 = vmul.f32 -1.442695, %v208_v28  ;;  %v211_v32 = vadd.f32 %v322_v26, %v210_v30  ;;  %v379_v33 = vpop.f32.mrb[3].mxu1 }
 0x1bd   :  { %405 = vpow2.f32 %v331_v31  ;;  %v332_v34 = vmul.f32 -1.442695, %v211_v32 }
 0x1bf   :  { %407 = vpow2.f32 %v332_v34 }
 0x1c7   :  { %v406_v35 = vpop.eup %405 }
 0x1c8   :  { %v220_v36 = vadd.f32 1.0, %v406_v35 }
 0x1c9   :  { %v408_v37 = vpop.eup %407 }
 0x1ca   :  { %409 = vrcp.f32 %v220_v36  ;;  %v221_v38 = vadd.f32 1.0, %v408_v37 }
 0x1cc   :  { %411 = vrcp.f32 %v221_v38 }
 0x1d4   :  { %v410_v39 = vpop.eup %409 }
 0x1d5   :  { %v226_v41 = vmul.f32 %v410_v39, %v491_v3 }
 0x1d6   :  { %v412_v40 = vpop.eup %411 }
 0x1d7   :  { %v227_v42 = vmul.f32 %v412_v40, %v496_v4 }
 0x1d9   :  { %v228_v43 = vpack.c.bf16 %v227_v42, %v226_v41 }
 0x1db   :  { %385 = vmatmul.mubr.msk.bf16.vlgmr.msra.gmra.mrb[4].mxu0 %vm54_vm1, %v228_v43 }
 0x2ae   :  { %v289_v45 = vpop.f32.mrb[4].mxu0 }
 0x2af   :  { %v290_v46 = vadd.f32 %v333_v44, %v289_v45  ;;  %v386_v47 = vpop.f32.mrb[5].mxu0 }
 0x2b0   :  { %v292_v48 = vpop.f32.mrb[6].mxu0 }
 0x2b1   :  { %297 = vst.msk [vmem:[#allocation2] sm:$0xff] %vm296_vm2, %v290_v46  ;;  %v293_v49 = vadd.f32 %v333_v44, %v292_v48  ;;  %v387_v50 = vpop.f32.mrb[7].mxu0 }
 0x2b2   :  { %300 = vst.msk [vmem:[#allocation2] sm:$0xff] %vm299_vm3, %v93_v16 }
 0x2b3   :  { %298 = vst.msk [vmem:[#allocation2 + $0x8] sm:$0xff] %vm296_vm2, %v293_v49 }
 0x2b4   :  { %301 = vst.msk [vmem:[#allocation2 + $0x8] sm:$0xff] %vm299_vm3, %v96_v19 }
 0x2b5   :  { %306 = vsyncadd [#allocation3], 128  ;;  %s439_s29 = smov [#allocation2]  }
 0x2b6   :  { %s307_s30 = sshll.u32 %s439_s29, 4  ;;  %s308_s30 = int_to_ptr.vmem [resolvable:$true] %s307_s30 }
 0x2b7   :  { %s413_s8 = scalar_lea.vmem %s308_s30, 128  ;;  %s417_s9 = scalar_lea.vmem %s308_s30, 256 }
 0x2b8   :  { %p414_p0 = scmp.ne.s32.totalorder %s308_s30, %s413_s8  ;;  %p418_p1 = scmp.lt.s32.totalorder %s308_s30, %s308_s30 }
 0x2b9   :  { %p419_p2 = scmp.lt.s32.totalorder %s417_s9, %s413_s8 }
 0x2bb   :  { %p420_p3 = por %p419_p2, %p418_p1 }
 0x2bd   :  { %p421_p4 = pnand %p420_p3, %p414_p0 }
 0x2bf   :  { %424 = shalt.err (!%p421_p4)
}
 0x2c0   :  { %s425_s1 = scalar_lea.hbm %s562_s7, 128 }
 0x2c1   :  { %p426_p5 = scmp.ne.s32.totalorder %s562_s7, %s425_s1  ;;  %p429_p6 = scmp.lt.u32.totalorder %s425_s1, %s562_s7 }
 0x2c3   :  { %p431_p7 = pnand %p429_p6, %p426_p5 }
 0x2c5   :  { %434 = shalt.err (!%p431_p7)
}
 0x2c6   :  { %s440_s14 = smov 128   ;;  %s441_s15 = smov 8  }
 0x2c7   :  { %313 = dma.vmem_to_hbm [thread:$0]  %s308_s30, 128, %s562_s7, [#allocation3], %s440_s14, %s440_s14, %s441_s15  }
 0x2c8   :  { %435 = dma.done.wait [#allocation3], 256  }
 0x2c9   :  { %436 = vsyncadd [#allocation3], 4294967040 }
 0x2ca   :  { %317 = vsyncpa [#allocation3], 1 }

</bundles_post_ra>
